<compile_context>
chip_gen: v6e
topology: v6e:2x2x1
jax: 0.10.0
libtpu: 0.0.40
codegen_flags: <defaults>
</compile_context>

<pallas_src>
import functools

import jax
import jax.numpy as jnp
from jax.experimental import pallas as pl
from jax.experimental.pallas import tpu as pltpu


def _proj_bias_kernel(x_ref, w_ref, b_ref, o_ref, acc_ref):
    # x_ref: (tm, tk)  w_ref: (tk, tn)  b_ref: (1, tn)  o_ref/acc_ref: (tm, tn)
    @pl.when(pl.program_id(2) == 0)
    def _init():
        acc_ref[...] = jnp.zeros_like(acc_ref)

    acc_ref[...] += jnp.dot(x_ref[...], w_ref[...],
                            preferred_element_type=jnp.float32)

    @pl.when(pl.program_id(2) == pl.num_programs(2) - 1)
    def _finalize():
        # Bias added once per output tile, not once per K step.
        o_ref[...] = (acc_ref[...] + b_ref[...].astype(jnp.float32)
                      ).astype(o_ref.dtype)


def _proj_nobias_kernel(x_ref, w_ref, o_ref, acc_ref):
    @pl.when(pl.program_id(2) == 0)
    def _init():
        acc_ref[...] = jnp.zeros_like(acc_ref)

    acc_ref[...] += jnp.dot(x_ref[...], w_ref[...],
                            preferred_element_type=jnp.float32)

    @pl.when(pl.program_id(2) == pl.num_programs(2) - 1)
    def _finalize():
        o_ref[...] = acc_ref[...].astype(o_ref.dtype)


def _round_up(v, m):
    return ((v + m - 1) // m) * m


def _pick_tile_k(d_model, default_tk):
    # K is a reduction axis: a partial (padded) K block would add garbage into
    # the accumulator, so tile_k must divide d_model exactly (or be d_model).
    if d_model <= default_tk:
        return d_model
    for cand in range(default_tk, 0, -128):
        if cand > 0 and d_model % cand == 0:
            return cand
    return d_model


@functools.partial(jax.jit,
                   static_argnames=("heads", "d_k", "tile_m", "tile_n", "tile_k"))
def prepare_for_mha(x, weight, bias=None, *, heads, d_k,
                    tile_m=512, tile_n=512, tile_k=1024):
    """Pallas equivalent of PrepareForMultiHeadAttention.forward.

    x:      [..., d_model]
    weight: [d_model, heads * d_k]   (PyTorch nn.Linear weight, transposed)
    bias:   [heads * d_k] or None
    returns [..., heads, d_k]
    """
    head_shape = x.shape[:-1]
    d_model = x.shape[-1]
    n_out = heads * d_k
    assert weight.shape == (d_model, n_out), weight.shape

    x2d = x.reshape(-1, d_model)
    m = x2d.shape[0]

    # ---- tile selection --------------------------------------------------
    # M: sublane-aligned (multiple of 8); partial edge-block writes are masked.
    tm = tile_m if m > tile_m else max(8, _round_up(m, 8))
    # N: lane-dense (multiple of 128) unless the whole output fits in one tile.
    tn = tile_n if n_out > tile_n else n_out
    # K: must divide d_model exactly (reduction axis).
    tk = _pick_tile_k(d_model, tile_k)

    grid = (pl.cdiv(m, tm), pl.cdiv(n_out, tn), pl.cdiv(d_model, tk))

    in_specs = [
        pl.BlockSpec((tm, tk), lambda i, j, k: (i, k)),   # x tile
        pl.BlockSpec((tk, tn), lambda i, j, k: (k, j)),   # weight tile
    ]
    args = [x2d, weight]
    if bias is not None:
        in_specs.append(pl.BlockSpec((1, tn), lambda i, j, k: (0, j)))
        args.append(bias.reshape(1, n_out))
        kernel = _proj_bias_kernel
    else:
        kernel = _proj_nobias_kernel

    itemsize = x.dtype.itemsize
    cost = pl.CostEstimate(
        flops=2 * m * d_model * n_out,
        transcendentals=0,
        bytes_accessed=itemsize * (m * d_model + d_model * n_out + m * n_out
                                   + (0 if bias is None else n_out)),
    )

    out2d = pl.pallas_call(
        kernel,
        out_shape=jax.ShapeDtypeStruct((m, n_out), x.dtype),
        grid_spec=pltpu.PrefetchScalarGridSpec(
            num_scalar_prefetch=0,
            grid=grid,
            in_specs=in_specs,
            out_specs=pl.BlockSpec((tm, tn), lambda i, j, k: (i, j)),
            scratch_shapes=[pltpu.VMEM((tm, tn), jnp.float32)],
        ),
        compiler_params=pltpu.CompilerParams(
            dimension_semantics=("parallel", "parallel", "arbitrary")),
        cost_estimate=cost,
    )(*args)

    return out2d.reshape(*head_shape, heads, d_k)


if __name__ == "__main__":
    key = jax.random.PRNGKey(0)
    k_x, k_w, k_b, k_x2, k_xl, k_wl = jax.random.split(key, 6)

    # --- small config consistent with the PyTorch module -------------------
    d_model, heads, d_k = 32, 4, 16
    batch, seq_len = 2, 8
    n_out = heads * d_k

    weight = jax.random.normal(k_w, (d_model, n_out), jnp.float32) / (d_model ** 0.5)
    bias = jax.random.normal(k_b, (n_out,), jnp.float32) * 0.02
    x = jax.random.normal(k_x, (batch, seq_len, d_model), jnp.float32)

    out = jax.block_until_ready(
        prepare_for_mha(x, weight, bias, heads=heads, d_k=d_k))
    assert out.shape == (batch, seq_len, heads, d_k), out.shape
    ref = (x.reshape(-1, d_model) @ weight + bias).reshape(
        batch, seq_len, heads, d_k)
    assert jnp.allclose(out, ref, atol=1e-4, rtol=1e-4)

    # --- 2-D input path: [batch, d_model] -> [batch, heads, d_k] -----------
    x2 = jax.random.normal(k_x2, (batch, d_model), jnp.float32)
    out2 = jax.block_until_ready(
        prepare_for_mha(x2, weight, bias, heads=heads, d_k=d_k))
    assert out2.shape == (batch, heads, d_k), out2.shape
    ref2 = (x2 @ weight + bias).reshape(batch, heads, d_k)
    assert jnp.allclose(out2, ref2, atol=1e-4, rtol=1e-4)

    # --- exercise the multi-tile (M, N, K) grid + accumulator path, no bias
    d_model_l, heads_l, d_k_l = 256, 4, 64      # n_out = 256
    batch_l, seq_l = 2, 64                       # m = 128
    w_l = jax.random.normal(k_wl, (d_model_l, heads_l * d_k_l), jnp.float32)
    w_l = w_l / (d_model_l ** 0.5)
    x_l = jax.random.normal(k_xl, (batch_l, seq_l, d_model_l), jnp.float32)
    out_l = jax.block_until_ready(
        prepare_for_mha(x_l, w_l, None, heads=heads_l, d_k=d_k_l,
                        tile_m=64, tile_n=128, tile_k=128))
    ref_l = (x_l.reshape(-1, d_model_l) @ w_l).reshape(
        batch_l, seq_l, heads_l, d_k_l)
    assert out_l.shape == ref_l.shape, out_l.shape
    assert jnp.allclose(out_l, ref_l, atol=1e-2, rtol=1e-2)

    print("KERNEL_OK")
</pallas_src>

<mosaic_0001>
module attributes {stable_mosaic.version = 11 : i64} {
  func.func @_proj_bias_kernel(%arg0: i32, %arg1: i32, %arg2: i32, %arg3: memref<16x32xf32, #tpu.memory_space<vmem>>, %arg4: memref<32x64xf32, #tpu.memory_space<vmem>>, %arg5: memref<1x64xf32, #tpu.memory_space<vmem>>, %arg6: memref<16x64xf32, #tpu.memory_space<vmem>>, %arg7: memref<16x64xf32, #tpu.memory_space<vmem>>) attributes {dimension_semantics = [#tpu.dimension_semantics<parallel>, #tpu.dimension_semantics<parallel>, #tpu.dimension_semantics<arbitrary>], iteration_bounds = array<i64: 1, 1, 1>, scalar_prefetch = 0 : i64, scratch_operands = 1 : i64, tpu.core_type = #tpu.core_type<tc>, window_params = [{transform_indices = @transform_0, window_bounds = array<i64: 16, 32>}, {transform_indices = @transform_1, window_bounds = array<i64: 32, 64>}, {transform_indices = @transform_2, window_bounds = array<i64: 1, 64>}, {transform_indices = @transform_3, window_bounds = array<i64: 16, 64>}]} {
    %c0_i32 = arith.constant 0 : i32
    %0 = arith.cmpi eq, %arg2, %c0_i32 : i32
    %1 = arith.extui %0 : i1 to i32
    %c0_i32_0 = arith.constant 0 : i32
    %2 = arith.cmpi ne, %1, %c0_i32_0 : i32
    scf.if %2 {
      %cst_10 = arith.constant 0.000000e+00 : f32
      %12 = vector.broadcast %cst_10 : f32 to vector<16x64xf32>
      %c0_11 = arith.constant 0 : index
      %c0_12 = arith.constant 0 : index
      %13 = vector.load %arg7[%c0_11, %c0_12] : memref<16x64xf32, #tpu.memory_space<vmem>>, vector<16x64xf32>
      tpu.vector_store %arg7[%c0_11, %c0_12], %12 {strides = array<i32>} : memref<16x64xf32, #tpu.memory_space<vmem>>, vector<16x64xf32>,
    } else {
    }
    %c0 = arith.constant 0 : index
    %c0_1 = arith.constant 0 : index
    %3 = vector.load %arg7[%c0, %c0_1] : memref<16x64xf32, #tpu.memory_space<vmem>>, vector<16x64xf32>
    %c0_2 = arith.constant 0 : index
    %c0_3 = arith.constant 0 : index
    %4 = vector.load %arg3[%c0_2, %c0_3] : memref<16x32xf32, #tpu.memory_space<vmem>>, vector<16x32xf32>
    %c0_4 = arith.constant 0 : index
    %c0_5 = arith.constant 0 : index
    %5 = vector.load %arg4[%c0_4, %c0_5] : memref<32x64xf32, #tpu.memory_space<vmem>>, vector<32x64xf32>
    %cst = arith.constant dense<0.000000e+00> : vector<16x64xf32>
    %6 = tpu.matmul %4, %5, %cst {dimension_numbers = #tpu.dot_dimension_numbers<[1], [0], [0], [1], [0, 0, 1, 1], [], []>} : vector<16x32xf32>, vector<32x64xf32>, vector<16x64xf32> -> vector<16x64xf32>
    %7 = arith.addf %3, %6 : vector<16x64xf32>
    %c0_6 = arith.constant 0 : index
    %c0_7 = arith.constant 0 : index
    %8 = vector.load %arg7[%c0_6, %c0_7] : memref<16x64xf32, #tpu.memory_space<vmem>>, vector<16x64xf32>
    tpu.vector_store %arg7[%c0_6, %c0_7], %7 {strides = array<i32>} : memref<16x64xf32, #tpu.memory_space<vmem>>, vector<16x64xf32>,
    %c0_i32_8 = arith.constant 0 : i32
    %9 = arith.cmpi eq, %arg2, %c0_i32_8 : i32
    %10 = arith.extui %9 : i1 to i32
    %c0_i32_9 = arith.constant 0 : i32
    %11 = arith.cmpi ne, %10, %c0_i32_9 : i32
    scf.if %11 {
      %c0_10 = arith.constant 0 : index
      %c0_11 = arith.constant 0 : index
      %12 = vector.load %arg7[%c0_10, %c0_11] : memref<16x64xf32, #tpu.memory_space<vmem>>, vector<16x64xf32>
      %c0_12 = arith.constant 0 : index
      %c0_13 = arith.constant 0 : index
      %13 = vector.load %arg5[%c0_12, %c0_13] : memref<1x64xf32, #tpu.memory_space<vmem>>, vector<1x64xf32>
      %14 = vector.broadcast %13 : vector<1x64xf32> to vector<16x64xf32>
      %15 = arith.addf %12, %14 : vector<16x64xf32>
      %c0_14 = arith.constant 0 : index
      %c0_15 = arith.constant 0 : index
      %16 = vector.load %arg6[%c0_14, %c0_15] : memref<16x64xf32, #tpu.memory_space<vmem>>, vector<16x64xf32>
      tpu.vector_store %arg6[%c0_14, %c0_15], %15 {strides = array<i32>} : memref<16x64xf32, #tpu.memory_space<vmem>>, vector<16x64xf32>,
    } else {
    }
    return
  }
  func.func @transform_0(%arg0: i32, %arg1: i32, %arg2: i32) -> (i32, i32) {
    %c0_i32 = arith.constant 0 : i32
    return %arg0, %arg2 : i32, i32
  }
  func.func @transform_1(%arg0: i32, %arg1: i32, %arg2: i32) -> (i32, i32) {
    %c0_i32 = arith.constant 0 : i32
    return %arg2, %arg1 : i32, i32
  }
  func.func @transform_2(%arg0: i32, %arg1: i32, %arg2: i32) -> (i32, i32) {
    %c0_i32 = arith.constant 0 : i32
    %c0_i32_0 = arith.constant 0 : i32
    return %c0_i32, %arg1 : i32, i32
  }
  func.func @transform_3(%arg0: i32, %arg1: i32, %arg2: i32) -> (i32, i32) {
    %c0_i32 = arith.constant 0 : i32
    return %arg0, %arg1 : i32, i32
  }
}

</mosaic_0001>

<bundles_post_ra>
// kernel: prepare_for_mha.1
= control target key start
LH: loop header
LB: loop body
LE: loop exit
PB: predicated region body
PF: predicated region fallthrough
CT: control target
= control target key end

     0   :  { %8 = vsyncpa [#allocation4], 0  ;;  %s283_s0 = inlined_call_operand.hbm [shape: f32[16,32], index: 0, kind: input, shape index: {}]   ;;  %s284_s1 = inlined_call_operand.hbm [shape: f32[32,64], index: 1, kind: input, shape index: {}]   ;;  %s285_s2 = inlined_call_operand.vmem [shape: f32[1,64], index: 2, kind: input, shape index: {}]   ;;  %s286_s3 = inlined_call_operand.vmem [shape: f32[16,64], index: 3, kind: output, shape index: {}]  }
   0x1   :  { %9 = vsyncpa [#allocation6], 0  ;;  %s235_s12 = smov [#allocation3]  }
   0x2   :  { %s15_s13 = sshll.u32 %s235_s12, 4  ;;  %s16_s13 = int_to_ptr.vmem [resolvable:$true] %s15_s13 }
   0x3   :  { %s199_s14 = scalar_lea.vmem %s16_s13, 256  ;;  %p204_p1 = scmp.lt.s32.totalorder %s16_s13, %s16_s13 }
   0x4   :  { %p200_p0 = scmp.ne.s32.totalorder %s16_s13, %s199_s14  ;;  %p205_p2 = scmp.lt.s32.totalorder %s199_s14, %s199_s14 }
   0x6   :  { %p206_p3 = por %p205_p2, %p204_p1 }
   0x8   :  { %p207_p4 = pnand %p206_p3, %p200_p0 }
   0xa   :  { %210 = shalt.err (!%p207_p4)
}
   0xb   :  { %s236_s15 = smov 128   ;;  %s237_s16 = smov 8  }
   0xc   :  { %21 = dma.hbm_to_vmem [thread:$0]  %s283_s0, 256, %s16_s13, [#allocation4], %s236_s15, %s236_s15, %s237_s16  }
   0xd   :  { %s238_s19 = smov [#allocation5]  }
   0xe   :  { %s27_s20 = sshll.u32 %s238_s19, 4  ;;  %s28_s20 = int_to_ptr.vmem [resolvable:$true] %s27_s20 }
   0xf   :  { %s219_s21 = scalar_lea.vmem %s28_s20, 512  ;;  %p224_p6 = scmp.lt.s32.totalorder %s28_s20, %s28_s20 }
  0x10   :  { %p220_p5 = scmp.ne.s32.totalorder %s28_s20, %s219_s21  ;;  %p225_p7 = scmp.lt.s32.totalorder %s219_s21, %s219_s21 }
  0x12   :  { %p226_p8 = por %p225_p7, %p224_p6 }
  0x14   :  { %p227_p9 = pnand %p226_p8, %p220_p5 }
  0x16   :  { %230 = shalt.err (!%p227_p9)
}
  0x17   :  { %33 = dma.hbm_to_vmem [thread:$0]  %s284_s1, 512, %s28_s20, [#allocation6], %s236_s15, %s236_s15, %s237_s16  }
  0x18   :  { %231 = dma.done.wait [#allocation4], 256  }
  0x19   :  { %232 = vsyncadd [#allocation4], 4294967040 }
  0x1a   :  { %233 = dma.done.wait [#allocation6], 512  }
  0x1b   :  { %234 = vsyncadd [#allocation6], 4294966784  ;;  %vm46_vm0 = vcmask 523264   ;;  %v239_v0 = vmov 0.0   ;;  %vm57_vm1 = vcmask 261120   ;;  %v56_v1 = vld [vmem:[#allocation5 + $0x18] sm:$0xff] }
  0x1c   :  { %48 = vst.msk [vmem:[#allocation2 + $0x8] sm:$0xff] %vm46_vm0, %v239_v0  ;;  %47 = vst.msk [vmem:[#allocation2] sm:$0xff] %vm46_vm0, %v239_v0  ;;  %v55_v2 = vld [vmem:[#allocation5 + $0x10] sm:$0xff]  ;;  %175 = vmatprep.subr.mxu0 %v56_v1  ;;  %v54_v4 = vld [vmem:[#allocation5 + $0x8] sm:$0xff] }
  0x1d   :  { %v51_v3 = vld [vmem:[#allocation3] sm:$0xff]  ;;  %176 = vmatpush3.msra.mxu0 %v56_v1  ;;  %v53_v5 = vld [vmem:[#allocation5] sm:$0xff]  ;;  %v52_v6 = vld [vmem:[#allocation3 + $0x8] sm:$0xff] }
  0x1e   :  { %183 = vmatprep.mubr.msk.f32.mxu0 %vm57_vm1, %v51_v3  ;;  %177 = vmatprep.subr.mxu0 %v55_v2  ;;  %v168_v13 = vld [vmem:[%s285_s2] ss:$0 sm:$0xff] }
  0x1f   :  { %178 = vmatpush3.msra.mxu0 %v55_v2 }
  0x20   :  { %179 = vmatprep.subr.mxu0 %v54_v4 }
  0x21   :  { %180 = vmatpush3.msra.mxu0 %v54_v4 }
  0x22   :  { %181 = vmatprep.subr.mxu0 %v53_v5 }
  0x23   :  { %182 = vmatpush3.msra.mxu0 %v53_v5  ;;  %v50_v7 = vld [vmem:[#allocation2 + $0x8] sm:$0xff]  ;;  %v49_v9 = vld [vmem:[#allocation2] sm:$0xff] }
  0x24   :  { %184 = vmatmul.mubr.msk.f32.vlgmr.msra.gmra.mxu0 %vm57_vm1, %v52_v6 }
  0xe4   :  { %v185_v8 = vpop.f32.mrf.mxu0 }
  0xe5   :  { %v140_v10 = vadd.f32 %v185_v8, %v50_v7 }
  0xe6   :  { %v130_v11 = vpop.f32.mrf.mxu0 }
  0xe7   :  { %143 = vst.msk [vmem:[#allocation2 + $0x8] sm:$0xff] %vm46_vm0, %v140_v10  ;;  %v139_v12 = vadd.f32 %v130_v11, %v49_v9 }
  0xe9   :  { %142 = vst.msk [vmem:[#allocation2] sm:$0xff] %vm46_vm0, %v139_v12 }
  0xee   :  { %v148_v14 = vld [vmem:[#allocation2 + $0x8] sm:$0xff] }
  0xef   :  { %v157_v15 = vadd.f32 %v168_v13, %v148_v14 }
  0xf0   :  { %v147_v16 = vld [vmem:[#allocation2] sm:$0xff] }
  0xf1   :  { %159 = vst.msk [vmem:[%s286_s3 + $0x8] sm:$0xff] %vm46_vm0, %v157_v15  ;;  %v156_v17 = vadd.f32 %v168_v13, %v147_v16 }
  0xf3   :  { %158 = vst.msk [vmem:[%s286_s3] sm:$0xff] %vm46_vm0, %v156_v17 }
  0xf4   :  { %164 = vsyncpa [#allocation4], 1 }
  0xf5   :  { %165 = vsyncpa [#allocation6], 1 }

</bundles_post_ra>
